<compile_context>
chip_gen: v6e
topology: v6e:2x2x1
jax: 0.10.0
libtpu: 0.0.40
codegen_flags: <defaults>
</compile_context>

<pallas_src>
import jax
import jax.numpy as jnp
from jax.experimental import pallas as pl
from jax.experimental.pallas import tpu as pltpu


def _round_up(x: int, m: int) -> int:
    return ((x + m - 1) // m) * m


def _make_sixd_kernel(C: int):
    """Kernel over a (tile_n, R*C) block: keep cols {0,1, C,C+1, 2C,2C+1}."""

    def kernel(m_ref, o_ref):
        o_ref[...] = jnp.concatenate(
            [
                m_ref[:, 0:2],
                m_ref[:, C : C + 2],
                m_ref[:, 2 * C : 2 * C + 2],
            ],
            axis=-1,
        )

    return kernel


def extract_sixd(matrix: jax.Array, *, min_pallas_bytes: int = 256 * 1024) -> jax.Array:
    """Pallas implementation of `matrix[..., :3, :2]`."""
    *batch, R, C = matrix.shape
    assert R >= 3 and C >= 2, "ExtractSixd needs at least a 3x2 trailing block"

    n = 1
    for b in batch:
        n *= b
    if n == 0:
        return jnp.zeros((*batch, 3, 2), matrix.dtype)

    itemsize = jnp.dtype(matrix.dtype).itemsize

    # Tiny batches: the pallas_call launch + a single partial block is pure
    # fixed overhead; XLA's fused strided slice is strictly faster here.
    if n * R * C * itemsize < min_pallas_bytes:
        return matrix[..., :3, :2]

    RC = R * C
    # Metadata-only flatten (contiguous row-major): each matrix is one row of
    # RC lanes; the six wanted elements sit at lanes {0,1, C,C+1, 2C,2C+1}.
    flat = matrix.reshape((n, RC))

    # Sublane granule: sub-32-bit dtypes pack 2/4 rows per sublane.
    granule = {4: 8, 2: 16, 1: 32}.get(itemsize, 8)
    # 4096 rows -> padded (4096, 128) buffers: ~2 MiB each (f32), ~8 MiB total
    # double-buffered in+out; fits v5e's 16 MiB scoped default with headroom.
    tile_n = min(4096, _round_up(n, granule))
    grid = (pl.cdiv(n, tile_n),)

    cost = pl.CostEstimate(
        flops=0,
        transcendentals=0,
        bytes_accessed=n * (RC + 6) * itemsize,
    )

    out_flat = pl.pallas_call(
        _make_sixd_kernel(C),
        out_shape=jax.ShapeDtypeStruct((n, 6), matrix.dtype),
        grid=grid,
        in_specs=[pl.BlockSpec((tile_n, RC), lambda i: (i, 0))],
        out_specs=pl.BlockSpec((tile_n, 6), lambda i: (i, 0)),
        compiler_params=pltpu.CompilerParams(
            dimension_semantics=("parallel",)
        ),
        cost_estimate=cost,
    )(flat)

    return out_flat.reshape((*batch, 3, 2))


if __name__ == "__main__":
    key = jax.random.PRNGKey(0)
    k0, k1, k2, k3 = jax.random.split(key, 4)

    # 1) Canonical small case (batch=2, joints=4, 3x3): takes the XLA bypass.
    matrix = jax.random.normal(k0, (2, 4, 3, 3), dtype=jnp.float32)
    out = extract_sixd(matrix)
    jax.block_until_ready(out)
    assert out.shape == (2, 4, 3, 2), out.shape
    assert out.dtype == matrix.dtype
    assert jnp.array_equal(out, matrix[..., :3, :2]), "bypass path mismatch"

    # 2) Same small case forced through the Pallas kernel (single block).
    out_forced = extract_sixd(matrix, min_pallas_bytes=0)
    jax.block_until_ready(out_forced)
    assert jnp.array_equal(out_forced, matrix[..., :3, :2]), "forced kernel mismatch"

    # 3) Kernel path with a partial tail block (n = 9216 = 2*4096 + 1024).
    matrix_big = jax.random.normal(k1, (72, 128, 3, 3), dtype=jnp.float32)
    out_big = extract_sixd(matrix_big)
    jax.block_until_ready(out_big)
    assert out_big.shape == (72, 128, 3, 2)
    assert jnp.array_equal(out_big, matrix_big[..., :3, :2]), "tail-block mismatch"

    # 4) Non-3x3 matrices (4x4) through the same 2D kernel path.
    matrix_44 = jax.random.normal(k2, (8192, 4, 4), dtype=jnp.float32)
    out_44 = extract_sixd(matrix_44)
    jax.block_until_ready(out_44)
    assert jnp.array_equal(out_44, matrix_44[..., :3, :2]), "4x4 mismatch"

    # 5) bf16 (16-row sublane granule) through the kernel path.
    matrix_bf16 = jax.random.normal(k3, (16384, 3, 3), dtype=jnp.float32).astype(
        jnp.bfloat16
    )
    out_bf16 = extract_sixd(matrix_bf16)
    jax.block_until_ready(out_bf16)
    assert out_bf16.dtype == jnp.bfloat16
    assert jnp.array_equal(out_bf16, matrix_bf16[..., :3, :2]), "bf16 mismatch"

    print("KERNEL_OK")
</pallas_src>

<mosaic_0001>
module attributes {stable_mosaic.version = 11 : i64} {
  func.func @kernel(%arg0: i32, %arg1: memref<8x9xf32, #tpu.memory_space<vmem>>, %arg2: memref<8x6xf32, #tpu.memory_space<vmem>>) attributes {dimension_semantics = [#tpu.dimension_semantics<parallel>], iteration_bounds = array<i64: 1>, scalar_prefetch = 0 : i64, scratch_operands = 0 : i64, tpu.core_type = #tpu.core_type<tc>, window_params = [{transform_indices = @transform_0, window_bounds = array<i64: 8, 9>}, {transform_indices = @transform_1, window_bounds = array<i64: 8, 6>}]} {
    %c0 = arith.constant 0 : index
    %c0_0 = arith.constant 0 : index
    %0 = vector.load %arg1[%c0, %c0_0] : memref<8x9xf32, #tpu.memory_space<vmem>>, vector<8x2xf32>
    %c0_1 = arith.constant 0 : index
    %c3 = arith.constant 3 : index
    %1 = vector.load %arg1[%c0_1, %c3] : memref<8x9xf32, #tpu.memory_space<vmem>>, vector<8x2xf32>
    %c0_2 = arith.constant 0 : index
    %c6 = arith.constant 6 : index
    %2 = vector.load %arg1[%c0_2, %c6] : memref<8x9xf32, #tpu.memory_space<vmem>>, vector<8x2xf32>
    %3 = tpu.concatenate %0, %1, %2 in 1 : vector<8x2xf32>, vector<8x2xf32>, vector<8x2xf32> -> vector<8x6xf32>
    %c0_3 = arith.constant 0 : index
    %c0_4 = arith.constant 0 : index
    %4 = vector.load %arg2[%c0_3, %c0_4] : memref<8x6xf32, #tpu.memory_space<vmem>>, vector<8x6xf32>
    tpu.vector_store %arg2[%c0_3, %c0_4], %3 {strides = array<i32>} : memref<8x6xf32, #tpu.memory_space<vmem>>, vector<8x6xf32>,
    return
  }
  func.func @transform_0(%arg0: i32) -> (i32, i32) {
    %c0_i32 = arith.constant 0 : i32
    %c0_i32_0 = arith.constant 0 : i32
    return %arg0, %c0_i32 : i32, i32
  }
  func.func @transform_1(%arg0: i32) -> (i32, i32) {
    %c0_i32 = arith.constant 0 : i32
    %c0_i32_0 = arith.constant 0 : i32
    return %arg0, %c0_i32 : i32, i32
  }
}

</mosaic_0001>

<bundles_post_ra>
// kernel: tpu_custom_call.1
= control target key start
LH: loop header
LB: loop body
LE: loop exit
PB: predicated region body
PF: predicated region fallthrough
CT: control target
= control target key end

     0   :  { %6 = vsyncpa [#allocation3], 0  ;;  %s118_s0 = inlined_call_operand.hbm [shape: f32[8,9], index: 0, kind: input, shape index: {}]   ;;  %s119_s1 = inlined_call_operand.hbm [shape: f32[8,6], index: 1, kind: output, shape index: {}]  }
   0x1   :  { %7 = vsyncpa [#allocation4], 0  ;;  %s98_s6 = smov [#allocation2]  }
   0x2   :  { %s14_s7 = sshll.u32 %s98_s6, 4  ;;  %s15_s7 = int_to_ptr.vmem [resolvable:$true] %s14_s7 }
   0x3   :  { %s62_s8 = scalar_lea.vmem %s15_s7, 128  ;;  %p67_p1 = scmp.lt.s32.totalorder %s15_s7, %s15_s7 }
   0x4   :  { %p63_p0 = scmp.ne.s32.totalorder %s15_s7, %s62_s8  ;;  %p68_p2 = scmp.lt.s32.totalorder %s62_s8, %s62_s8 }
   0x6   :  { %p69_p3 = por %p68_p2, %p67_p1 }
   0x8   :  { %p70_p4 = pnand %p69_p3, %p63_p0 }
   0xa   :  { %73 = shalt.err (!%p70_p4)
}
   0xb   :  { %17 = dma.hbm_to_vmem [thread:$0]  %s118_s0, 128, %s15_s7, [#allocation3]  }
   0xc   :  { %94 = dma.done.wait [#allocation3], 128  }
   0xd   :  { %95 = vsyncadd [#allocation3], 4294967168  ;;  %v21_v0 = vld [vmem:[#allocation2] sm:$0xff]  ;;  %s99_s11 = smov 127   ;;  %s100_s12 = smov 126   ;;  %vm29_vm0 = vcmask 15360  }
   0xe   :  { %23 = vrot.lane.b32.xlu0 %v21_v0, %s99_s11  ;;  %s101_s13 = smov [#allocation5]   ;;  %vm31_vm1 = vcmask 31744   ;;  %vm33_vm2 = vcmask 48128  }
   0xf   :  { %s41_s14 = sshll.u32 %s101_s13, 4  ;;  %s42_s14 = int_to_ptr.vmem [resolvable:$true] %s41_s14 }
  0x10   :  { %s74_s15 = scalar_lea.vmem %s42_s14, 128  ;;  %p79_p6 = scmp.lt.s32.totalorder %s42_s14, %s42_s14 }
  0x11   :  { %p75_p5 = scmp.ne.s32.totalorder %s42_s14, %s74_s15  ;;  %p80_p7 = scmp.lt.s32.totalorder %s74_s15, %s74_s15 }
  0x12   :  { %26 = vrot.lane.b32.xlu0 %v21_v0, %s100_s12 }
  0x13   :  { %p81_p8 = por %p80_p7, %p79_p6 }
  0x15   :  { %p82_p9 = pnand %p81_p8, %p75_p5 }
  0x80   :  { %v24_v1 = vpop.permute.xlu0 %23 }
  0x81   :  { %v30_v2 = vsel %vm29_vm0, %v21_v0, %v24_v1 }
  0x84   :  { %v27_v3 = vpop.permute.xlu0 %26 }
  0x85   :  { %v32_v4 = vsel %vm31_vm1, %v30_v2, %v27_v3 }
  0x86   :  { %34 = vst.msk [vmem:[#allocation5] sm:$0xff] %vm33_vm2, %v32_v4 }
  0x87   :  { %85 = shalt.err (!%p82_p9)
}
  0x88   :  { %44 = dma.vmem_to_hbm [thread:$0]  %s42_s14, 128, %s119_s1, [#allocation4]  }
  0x89   :  { %96 = dma.done.wait [#allocation4], 128  }
  0x8a   :  { %97 = vsyncadd [#allocation4], 4294967168 }
  0x8b   :  { %48 = vsyncpa [#allocation3], 1 }
  0x8c   :  { %49 = vsyncpa [#allocation4], 1 }

</bundles_post_ra>
